<compile_context>
chip_gen: v7x
topology: tpu7x:2x2x1
jax: 0.10.0
libtpu: 0.0.40
codegen_flags: <defaults>
</compile_context>

<pallas_src>
import functools
import math

import jax
import jax.numpy as jnp
from jax.experimental import pallas as pl
from jax.experimental.pallas import tpu as pltpu


def _round_up(x, m):
    return ((x + m - 1) // m) * m


def _attn_pooling_kernel(n_heads, h_ref, w1_ref, b1_ref, w2_ref, b2_ref, o_ref):
    # h_ref:  (N, Fp)   node features of the current graph (padded lanes)
    # w1_ref: (Fp, Dp)  b1_ref: (1, Dp)
    # w2_ref: (Dp, Hp)  b2_ref: (1, Hp)
    # o_ref:  (1, Fp)   pooled output row for the current graph
    h = h_ref[...]

    # fc1 + tanh  (MXU matmul, EUP tanh)
    z = jnp.tanh(
        jnp.dot(h, w1_ref[...], preferred_element_type=jnp.float32) + b1_ref[...])
    # fc2
    s = jnp.dot(z, w2_ref[...], preferred_element_type=jnp.float32) + b2_ref[...]

    # softmax over the node axis (axis=0), independently per head column
    m = jnp.max(s, axis=0, keepdims=True)
    e = jnp.exp(s - m)
    denom = jnp.sum(e, axis=0, keepdims=True)
    attn = e / denom                                        # (N, Hp)

    # zero out the padded head columns, then average the real heads per node
    head_idx = jax.lax.broadcasted_iota(jnp.int32, attn.shape, 1)
    attn = jnp.where(head_idx < n_heads, attn, 0.0)
    w_node = jnp.sum(attn, axis=1, keepdims=True) * (1.0 / n_heads)   # (N, 1)

    # pooled output: sum_n w_node[n] * h[n, :]  -> (1, Fp), lane-dense store
    o_ref[...] = jnp.sum(w_node * h, axis=0, keepdims=True)


def attn_pooling(h0, w1, b1, w2, b2, *, n_heads):
    """Pallas implementation of AttnPooling_0.forward for uniform graphs.

    h0: (B, N, F_in) node features, B graphs of N nodes each.
    w1: (F_in, D), b1: (D,)  -- fc1 (x @ w1 + b1)
    w2: (D, H),  b2: (H,)    -- fc2
    returns: (B, F_in) pooled graph representation.
    """
    b, n, f_in = h0.shape
    d = w1.shape[1]
    assert w2.shape == (d, n_heads)

    # Pad every feature (lane) dim up to 128 for unmasked, lane-dense access.
    fp = _round_up(f_in, 128)
    dp = _round_up(d, 128)
    hp = _round_up(n_heads, 128)

    h0p = jnp.pad(h0, ((0, 0), (0, 0), (0, fp - f_in)))
    w1p = jnp.pad(w1, ((0, fp - f_in), (0, dp - d)))
    b1p = jnp.pad(b1.reshape(1, d), ((0, 0), (0, dp - d)))
    w2p = jnp.pad(w2, ((0, dp - d), (0, hp - n_heads)))
    b2p = jnp.pad(b2.reshape(1, n_heads), ((0, 0), (0, hp - n_heads)))

    flops = b * (2 * n * fp * dp + 2 * n * dp * hp + 4 * n * hp + 3 * n * fp)
    transcendentals = b * n * (dp + hp)  # tanh + exp
    bytes_accessed = 4 * (h0p.size + w1p.size + b1p.size + w2p.size + b2p.size
                          + b * fp)

    kernel = functools.partial(_attn_pooling_kernel, n_heads)

    out = pl.pallas_call(
        kernel,
        out_shape=jax.ShapeDtypeStruct((b, 1, fp), jnp.float32),
        grid_spec=pltpu.PrefetchScalarGridSpec(
            num_scalar_prefetch=0,
            grid=(b,),
            in_specs=[
                pl.BlockSpec((None, n, fp), lambda i: (i, 0, 0)),   # h0 of graph i
                pl.BlockSpec((fp, dp), lambda i: (0, 0)),           # W1 (resident)
                pl.BlockSpec((1, dp), lambda i: (0, 0)),            # b1
                pl.BlockSpec((dp, hp), lambda i: (0, 0)),           # W2 (resident)
                pl.BlockSpec((1, hp), lambda i: (0, 0)),            # b2
            ],
            out_specs=pl.BlockSpec((None, 1, fp), lambda i: (i, 0, 0)),
        ),
        compiler_params=pltpu.CompilerParams(
            dimension_semantics=("parallel",)),
        cost_estimate=pl.CostEstimate(
            flops=flops,
            transcendentals=transcendentals,
            bytes_accessed=bytes_accessed),
    )(h0p, w1p, b1p, w2p, b2p)

    return out[:, 0, :f_in]


def attn_pooling_ref(h0, w1, b1, w2, b2):
    """Pure-JAX reference matching the PyTorch/DGL forward."""
    z = jnp.tanh(h0 @ w1 + b1)              # (B, N, D)
    s = z @ w2 + b2                         # (B, N, H)
    attn = jax.nn.softmax(s, axis=1)        # softmax over nodes per graph
    pooled = jnp.einsum('bnh,bnf->bhf', attn, h0)   # per-head weighted sums
    return pooled.mean(axis=1)              # mean over heads -> (B, F_in)


if __name__ == "__main__":
    B = 4         # graphs in the batch
    N = 16        # nodes per graph
    F_IN = 32     # in_features
    DENSE = 32    # dense_features
    N_HEADS = 4   # n_heads

    key = jax.random.PRNGKey(0)
    k_h, k_w1, k_b1, k_w2, k_b2 = jax.random.split(key, 5)

    h0 = jax.random.normal(k_h, (B, N, F_IN), dtype=jnp.float32)

    # nn.Linear-style init: uniform(-1/sqrt(fan_in), 1/sqrt(fan_in))
    s1 = 1.0 / math.sqrt(F_IN)
    w1 = jax.random.uniform(k_w1, (F_IN, DENSE), jnp.float32, -s1, s1)
    b1 = jax.random.uniform(k_b1, (DENSE,), jnp.float32, -s1, s1)
    s2 = 1.0 / math.sqrt(DENSE)
    w2 = jax.random.uniform(k_w2, (DENSE, N_HEADS), jnp.float32, -s2, s2)
    b2 = jax.random.uniform(k_b2, (N_HEADS,), jnp.float32, -s2, s2)

    out = attn_pooling(h0, w1, b1, w2, b2, n_heads=N_HEADS)
    out = jax.block_until_ready(out)

    ref = attn_pooling_ref(h0, w1, b1, w2, b2)
    assert out.shape == (B, F_IN)
    assert jnp.allclose(out, ref, atol=1e-4, rtol=1e-4), (
        float(jnp.max(jnp.abs(out - ref))))

    print("KERNEL_OK")
</pallas_src>

<mosaic_0001>
module attributes {stable_mosaic.version = 11 : i64} {
  func.func @_attn_pooling_kernel(%arg0: i32, %arg1: memref<1x16x128xf32, #tpu.memory_space<vmem>>, %arg2: memref<128x128xf32, #tpu.memory_space<vmem>>, %arg3: memref<1x128xf32, #tpu.memory_space<vmem>>, %arg4: memref<128x128xf32, #tpu.memory_space<vmem>>, %arg5: memref<1x128xf32, #tpu.memory_space<vmem>>, %arg6: memref<1x1x128xf32, #tpu.memory_space<vmem>>) attributes {dimension_semantics = [#tpu.dimension_semantics<parallel>], iteration_bounds = array<i64: 4>, scalar_prefetch = 0 : i64, scratch_operands = 0 : i64, tpu.core_type = #tpu.core_type<tc>, window_params = [{transform_indices = @transform_0, window_bounds = array<i64: 1, 16, 128>}, {pipeline_mode = #tpu.pipeline_mode<synchronous>, transform_indices = @transform_1, window_bounds = array<i64: 128, 128>}, {pipeline_mode = #tpu.pipeline_mode<synchronous>, transform_indices = @transform_2, window_bounds = array<i64: 1, 128>}, {pipeline_mode = #tpu.pipeline_mode<synchronous>, transform_indices = @transform_3, window_bounds = array<i64: 128, 128>}, {pipeline_mode = #tpu.pipeline_mode<synchronous>, transform_indices = @transform_4, window_bounds = array<i64: 1, 128>}, {transform_indices = @transform_5, window_bounds = array<i64: 1, 1, 128>}]} {
    %c0 = arith.constant 0 : index
    %c0_0 = arith.constant 0 : index
    %c0_1 = arith.constant 0 : index
    %0 = vector.load %arg1[%c0, %c0_0, %c0_1] : memref<1x16x128xf32, #tpu.memory_space<vmem>>, vector<1x16x128xf32>
    %1 = vector.shape_cast %0 : vector<1x16x128xf32> to vector<16x128xf32>
    %c0_2 = arith.constant 0 : index
    %c0_3 = arith.constant 0 : index
    %2 = vector.load %arg2[%c0_2, %c0_3] : memref<128x128xf32, #tpu.memory_space<vmem>>, vector<128x128xf32>
    %cst = arith.constant dense<0.000000e+00> : vector<16x128xf32>
    %3 = tpu.matmul %1, %2, %cst {dimension_numbers = #tpu.dot_dimension_numbers<[1], [0], [0], [1], [0, 0, 1, 1], [], []>} : vector<16x128xf32>, vector<128x128xf32>, vector<16x128xf32> -> vector<16x128xf32>
    %c0_4 = arith.constant 0 : index
    %c0_5 = arith.constant 0 : index
    %4 = vector.load %arg3[%c0_4, %c0_5] : memref<1x128xf32, #tpu.memory_space<vmem>>, vector<1x128xf32>
    %5 = vector.broadcast %4 : vector<1x128xf32> to vector<16x128xf32>
    %6 = arith.addf %3, %5 : vector<16x128xf32>
    %7 = math.tanh %6 : vector<16x128xf32>
    %c0_6 = arith.constant 0 : index
    %c0_7 = arith.constant 0 : index
    %8 = vector.load %arg4[%c0_6, %c0_7] : memref<128x128xf32, #tpu.memory_space<vmem>>, vector<128x128xf32>
    %cst_8 = arith.constant dense<0.000000e+00> : vector<16x128xf32>
    %9 = tpu.matmul %7, %8, %cst_8 {dimension_numbers = #tpu.dot_dimension_numbers<[1], [0], [0], [1], [0, 0, 1, 1], [], []>} : vector<16x128xf32>, vector<128x128xf32>, vector<16x128xf32> -> vector<16x128xf32>
    %c0_9 = arith.constant 0 : index
    %c0_10 = arith.constant 0 : index
    %10 = vector.load %arg5[%c0_9, %c0_10] : memref<1x128xf32, #tpu.memory_space<vmem>>, vector<1x128xf32>
    %11 = vector.broadcast %10 : vector<1x128xf32> to vector<16x128xf32>
    %12 = arith.addf %9, %11 : vector<16x128xf32>
    %cst_11 = arith.constant dense<0xFF800000> : vector<128xf32>
    %13 = vector.multi_reduction <maximumf>, %12, %cst_11 [0] : vector<16x128xf32> to vector<128xf32>
    %14 = vector.shape_cast %13 : vector<128xf32> to vector<1x128xf32>
    %15 = vector.broadcast %14 : vector<1x128xf32> to vector<16x128xf32>
    %16 = arith.subf %12, %15 : vector<16x128xf32>
    %17 = math.exp %16 : vector<16x128xf32>
    %cst_12 = arith.constant dense<0.000000e+00> : vector<128xf32>
    %18 = vector.multi_reduction <add>, %17, %cst_12 [0] : vector<16x128xf32> to vector<128xf32>
    %19 = vector.shape_cast %18 : vector<128xf32> to vector<1x128xf32>
    %20 = vector.broadcast %19 : vector<1x128xf32> to vector<16x128xf32>
    %21 = arith.divf %17, %20 : vector<16x128xf32>
    %22 = tpu.iota {dimensions = array<i32: 1>} : vector<16x128xi32>
    %c4_i32 = arith.constant 4 : i32
    %23 = vector.broadcast %c4_i32 : i32 to vector<16x128xi32>
    %24 = arith.cmpi slt, %22, %23 : vector<16x128xi32>
    %cst_13 = arith.constant 0.000000e+00 : f32
    %25 = vector.broadcast %cst_13 : f32 to vector<16x128xf32>
    %26 = arith.select %24, %21, %25 : vector<16x128xi1>, vector<16x128xf32>
    %cst_14 = arith.constant dense<0.000000e+00> : vector<16xf32>
    %27 = vector.multi_reduction <add>, %26, %cst_14 [1] : vector<16x128xf32> to vector<16xf32>
    %28 = vector.shape_cast %27 : vector<16xf32> to vector<16x1xf32>
    %cst_15 = arith.constant 2.500000e-01 : f32
    %29 = vector.broadcast %cst_15 : f32 to vector<16x1xf32>
    %30 = arith.mulf %28, %29 : vector<16x1xf32>
    %31 = vector.broadcast %30 : vector<16x1xf32> to vector<16x128xf32>
    %32 = arith.mulf %31, %1 : vector<16x128xf32>
    %cst_16 = arith.constant dense<0.000000e+00> : vector<128xf32>
    %33 = vector.multi_reduction <add>, %32, %cst_16 [0] : vector<16x128xf32> to vector<128xf32>
    %34 = vector.shape_cast %33 : vector<128xf32> to vector<1x128xf32>
    %c0_17 = arith.constant 0 : index
    %c0_18 = arith.constant 0 : index
    %c0_19 = arith.constant 0 : index
    %35 = vector.load %arg6[%c0_17, %c0_18, %c0_19] : memref<1x1x128xf32, #tpu.memory_space<vmem>>, vector<1x1x128xf32>
    %36 = vector.shape_cast %35 : vector<1x1x128xf32> to vector<1x128xf32>
    %37 = vector.shape_cast %34 : vector<1x128xf32> to vector<1x1x128xf32>
    tpu.vector_store %arg6[%c0_17, %c0_18, %c0_19], %37 {strides = array<i32>} : memref<1x1x128xf32, #tpu.memory_space<vmem>>, vector<1x1x128xf32>,
    return
  }
  func.func @transform_0(%arg0: i32) -> (i32, i32, i32) {
    %c0_i32 = arith.constant 0 : i32
    %c0_i32_0 = arith.constant 0 : i32
    %c0_i32_1 = arith.constant 0 : i32
    return %arg0, %c0_i32, %c0_i32_0 : i32, i32, i32
  }
  func.func @transform_1(%arg0: i32) -> (i32, i32) {
    %c0_i32 = arith.constant 0 : i32
    %c0_i32_0 = arith.constant 0 : i32
    %c0_i32_1 = arith.constant 0 : i32
    return %c0_i32, %c0_i32_0 : i32, i32
  }
  func.func @transform_2(%arg0: i32) -> (i32, i32) {
    %c0_i32 = arith.constant 0 : i32
    %c0_i32_0 = arith.constant 0 : i32
    %c0_i32_1 = arith.constant 0 : i32
    return %c0_i32, %c0_i32_0 : i32, i32
  }
  func.func @transform_3(%arg0: i32) -> (i32, i32) {
    %c0_i32 = arith.constant 0 : i32
    %c0_i32_0 = arith.constant 0 : i32
    %c0_i32_1 = arith.constant 0 : i32
    return %c0_i32, %c0_i32_0 : i32, i32
  }
  func.func @transform_4(%arg0: i32) -> (i32, i32) {
    %c0_i32 = arith.constant 0 : i32
    %c0_i32_0 = arith.constant 0 : i32
    %c0_i32_1 = arith.constant 0 : i32
    return %c0_i32, %c0_i32_0 : i32, i32
  }
  func.func @transform_5(%arg0: i32) -> (i32, i32, i32) {
    %c0_i32 = arith.constant 0 : i32
    %c0_i32_0 = arith.constant 0 : i32
    %c0_i32_1 = arith.constant 0 : i32
    return %arg0, %c0_i32, %c0_i32_0 : i32, i32, i32
  }
}

</mosaic_0001>

<bundles_post_ra>
// kernel: tpu_custom_call.1
= control target key start
LH: loop header
LB: loop body
LE: loop exit
PB: predicated region body
PF: predicated region fallthrough
CT: control target
= control target key end

     0   :  { %10 = vsyncpa [#allocation3], 0  ;;  %s1325_s0 = inlined_call_operand.hbm [shape: f32[4,16,128], index: 0, kind: input, shape index: {}]   ;;  %s1326_s1 = inlined_call_operand.hbm [shape: f32[128,128], index: 1, kind: input, shape index: {}]   ;;  %s1327_s2 = inlined_call_operand.vmem [shape: f32[1,128], index: 2, kind: input, shape index: {}]   ;;  %s1328_s3 = inlined_call_operand.hbm [shape: f32[128,128], index: 3, kind: input, shape index: {}]   ;;  %s1329_s4 = inlined_call_operand.vmem [shape: f32[1,128], index: 4, kind: input, shape index: {}]   ;;  %s1330_s5 = inlined_call_operand.hbm [shape: f32[4,1,128], index: 5, kind: output, shape index: {}]  }
   0x1   :  { %12 = vsyncpa [#allocation3 + $0x1], 0 }
   0x2   :  { %13 = vsyncpa [#allocation6], 0 }
   0x3   :  { %14 = vsyncpa [#allocation4], 0 }
   0x4   :  { %16 = vsyncpa [#allocation4 + $0x1], 0  ;;  %s1074_s18 = smov 0   ;;  %s1076_s19 = smov 0  }
   0x5   :  { %s1078_s20 = smov 0   ;;  %s1080_s21 = smov 0  }
   0x6 LB: > { %s1095_s22 = sadd.s32 4294967295, %s1036_s21   ;;  %s613_s23 = sadd.s32 4294967294, %s1036_s21   ;;  %s1036_s21 = sphi %s1080_s21, %s1349_s21   ;;  %s1032_s20 = sphi %s1078_s20, %s1348_s20   ;;  %s1028_s19 = sphi %s1076_s19, %s1347_s19   ;;  %s1024_s18 = sphi %s1074_s18, %s1346_s18  }
   0x7   : > { %p42_p0 = scmp.ne.s32.totalorder %s1028_s19, %s1024_s18  ;;  %p1331_p1 = scmp.eq.s32.totalorder %s1095_s22, 0 }
   0x8   : > { %p156_p3 = scmp.eq.s32.totalorder %s613_s23, 3  ;;  %p614_p5 = scmp.ge.s32.totalorder %s1036_s21, 1 }
   0x9   : > { %p1104_p4 = por %p1331_p1, %p42_p0  ;;  %p163_p7 = scmp.lt.s32.totalorder %s1036_s21, 5 }
   0xa   : > { %p1109_p6 = por %p156_p3, %p42_p0  ;;  %s1038_s27 = smov [#allocation5]  }
   0xb   : > { %s1334_s24 = scalar_select %p1104_p4, 1, 0 }
   0xc   : > { %s1335_s25 = scalar_select %p1109_p6, 1, 0 }
   0xd   : > { %p1114_p8 = pnand %p614_p5, %p163_p7  ;;  %s175_s28 = sshll.u32 %s1038_s27, 4  ;;  %s176_s28 = int_to_ptr.vmem [resolvable:$true] %s175_s28 }
   0xe   : > { %s1039_s30 = smov [#allocation7]   ;;  %s880_s9 = scalar_lea.hbm %s1326_s1, 2048 }
   0xf   : > { %s1336_s26 = scalar_select %p1114_p8, 1, 0 }
  0x10   : > { %p813_p9 = pneg %p1114_p8  ;;  %s191_s6 = sshll.u32 %s1039_s30, 4  ;;  %s1126_s6 = int_to_ptr.vmem [resolvable:$true] %s191_s6 }
  0x11   : > { %p881_p11 = scmp.ne.s32.totalorder %s1326_s1, %s880_s9  ;;  %p887_p3 = scmp.lt.u32.totalorder %s880_s9, %s1326_s1 }
  0x12   : > { %p1122_p10 = pnand %p813_p9, %p1331_p1 }
  0x14   : > { %p882_p12 = pneg %p1122_p10 }
  0x16   : > { %p883_p13 = pnand %p882_p12, %p881_p11 }
  0x18   : > { %p884_p0 = pneg %p883_p13 }
  0x1a   : > { %p889_p5 = pnand %p887_p3, %p884_p0 }
  0x1c   : > { %892 = shalt.err (!%p889_p5)
}
  0x1d   : > { %s893_s14 = scalar_lea.vmem %s176_s28, 2048  ;;  %p901_p2 = scmp.lt.s32.totalorder %s176_s28, %s176_s28 }
  0x1e   : > { %p894_p7 = scmp.ne.s32.totalorder %s176_s28, %s893_s14  ;;  %p902_p6 = scmp.lt.s32.totalorder %s893_s14, %s893_s14 }
  0x20   : > { %p896_p9 = pnand %p894_p7, %p882_p12  ;;  %p903_p4 = por %p902_p6, %p901_p2 }
  0x22   : > { %p897_p1 = pneg %p896_p9 }
  0x24   : > { %p904_p8 = pnand %p903_p4, %p897_p1 }
  0x26   : > { %907 = shalt.err (!%p904_p8)
}
  0x27   : > { %s1040_s15 = smov 128   ;;  %s1041_s16 = smov 8  }
  0x28   : > { %816 = dma.hbm_to_vmem [thread:$0]  (!%p1122_p10), %s1326_s1, 2048, %s176_s28, [#allocation6], %s1040_s15, %s1040_s15, %s1041_s16  }
  0x29   : > { %s908_s7 = scalar_lea.hbm %s1328_s3, 2048 }
  0x2a   : > { %p909_p1 = scmp.ne.s32.totalorder %s1328_s3, %s908_s7  ;;  %p915_p6 = scmp.lt.u32.totalorder %s908_s7, %s1328_s3 }
  0x2c   : > { %p911_p2 = pnand %p909_p1, %p882_p12 }
  0x2e   : > { %p912_p4 = pneg %p911_p2 }
  0x30   : > { %p917_p8 = pnand %p915_p6, %p912_p4 }
  0x32   : > { %920 = shalt.err (!%p917_p8)
}
  0x33   : > { %s921_s28 = scalar_lea.vmem %s1126_s6, 2048  ;;  %p929_p3 = scmp.lt.s32.totalorder %s1126_s6, %s1126_s6 }
  0x34   : > { %p922_p11 = scmp.ne.s32.totalorder %s1126_s6, %s921_s28  ;;  %p930_p5 = scmp.lt.s32.totalorder %s921_s28, %s921_s28 }
  0x36   : > { %p924_p13 = pnand %p922_p11, %p882_p12  ;;  %p931_p7 = por %p930_p5, %p929_p3 }
  0x38   : > { %p925_p0 = pneg %p924_p13 }
  0x3a   : > { %p932_p9 = pnand %p931_p7, %p925_p0 }
  0x3c   : > { %935 = shalt.err (!%p932_p9)
}
  0x3d   : > { %819 = dma.hbm_to_vmem [thread:$0]  (!%p1122_p10), %s1328_s3, 2048, %s1126_s6, [#allocation6], %s1040_s15, %s1040_s15, %s1041_s16  }
  0x3e   : > { %s1182_s29 = sadd.s32 1, %s1036_s21   ;;  %s29_s14 = sadd.s32 1, %s1032_s20 }
  0x3f   : > { %s26_s17 = ssub.s32 %s1036_s21, %s1182_s29  ;;  %p36_p12 = scmp.ne.s32.totalorder %s1032_s20, %s1028_s19 }
  0x40   : > { %p27_p1 = scmp.eq.s32.totalorder %s26_s17, 0  ;;  %p37_p2 = scmp.eq.s32.totalorder %s1036_s21, 0 }
  0x41   : > { %p1338_p4 = scmp.eq.s32.totalorder %s1095_s22, 3  ;;  %p830_p8 = scmp.lt.s32.totalorder %s1036_s21, 4 }
  0x42   : > { %s1198_s27 = scalar_select %p27_p1, %s1032_s20, %s29_s14  }
  0x43   : > { %p1192_p6 = por %p1338_p4, %p36_p12  ;;  %p38_p11 = por %p37_p2, %p36_p12 }
  0x44   : > { %s208_s30 = sand.u32 1, %s1032_s20   ;;  %s630_s6 = sshll.u32 %s1036_s21, 8 }
  0x45   : > { %s618_s7 = sshll.u32 %s208_s30, 4  ;;  %s1205_s10 = scalar_lea.hbm %s1325_s0, %s630_s6 }
  0x46   : > { %s212_s11 = scalar_lea.vmem [#allocation2], %s618_s7  ;;  %p1209_p10 = pnand %p830_p8, %p38_p11 }
  0x47   : > { %s219_s28 = sshll.u32 %s212_s11, 4  ;;  %s1213_s13 = scalar_lea.sflag [#allocation3], %s208_s30  ;;  %s1207_s28 = int_to_ptr.vmem [resolvable:$true] %s219_s28 }
  0x48   : > { %s936_s14 = scalar_lea.hbm %s1205_s10, 256  ;;  %p938_p0 = pneg %p1209_p10 }
  0x49   : > { %p937_p13 = scmp.ne.s32.totalorder %s1205_s10, %s936_s14  ;;  %s941_s6 = scalar_lea.hbm %s1325_s0, 1024 }
  0x4a   : > { %p942_p7 = scmp.lt.u32.totalorder %s1205_s10, %s1325_s0  ;;  %p943_p9 = scmp.lt.u32.totalorder %s941_s6, %s936_s14 }
  0x4b   : > { %p939_p3 = pnand %p938_p0, %p937_p13  ;;  %p945_p1 = scmp.lt.u32.totalorder %s936_s14, %s1205_s10 }
  0x4c   : > { %p944_p12 = por %p943_p9, %p942_p7 }
  0x4d   : > { %p940_p5 = pneg %p939_p3 }
  0x4e   : > { %p946_p2 = por %p945_p1, %p944_p12 }
  0x50   : > { %p947_p4 = pnand %p946_p2, %p940_p5 }
  0x52   : > { %950 = shalt.err (!%p947_p4)
}
  0x53   : > { %s951_s30 = scalar_lea.vmem %s1207_s28, 256  ;;  %s1042_s11 = smov [#allocation2]  }
  0x54   : > { %p952_p8 = scmp.ne.s32.totalorder %s1207_s28, %s951_s30  ;;  %s956_s17 = sshll.u32 %s1042_s11, 4  ;;  %s957_s17 = int_to_ptr.vmem [resolvable:$false] %s956_s17 }
  0x55   : > { %s958_s7 = scalar_lea.vmem %s957_s17, 512  ;;  %p959_p3 = scmp.lt.s32.totalorder %s1207_s28, %s957_s17 }
  0x56   : > { %p954_p11 = pnand %p952_p8, %p938_p0  ;;  %p960_p7 = scmp.lt.s32.totalorder %s958_s7, %s951_s30 }
  0x58   : > { %p955_p13 = pneg %p954_p11  ;;  %p961_p9 = por %p960_p7, %p959_p3 }
  0x5a   : > { %p962_p12 = pnand %p961_p9, %p955_p13 }
  0x5c   : > { %965 = shalt.err (!%p962_p12)
}
  0x5d   : > { %823 = dma.hbm_to_vmem [thread:$0]  (!%p1209_p10), %s1205_s10, 256, %s1207_s28, %s1213_s13, %s1040_s15, %s1040_s15, %s1041_s16  }
  0x5e   : > { %p1341_p0 = scmp.ne.s32.totalorder %s1336_s26, 0 }
  0x5f   : > { %s1247_s14 = sand.u32 (!%p1341_p0), 1, %s1028_s19   ;;  %p1342_p5 = scmp.ne.s32.totalorder (!%p1341_p0), %s1334_s24, 0 }
  0x60   : > { %231 = sbr.rel (%p1341_p0) target bundleno = 820 (0x334), region = 40  ;;  %s622_s6 = sshll.u32 (!%p1341_p0), %s1247_s14, 4 }
  0x61   : > { %s234_s8 = scalar_lea.sflag (!%p1341_p0), [#allocation3], %s1247_s14  ;;  %s1251_s9 = scalar_lea.vmem (!%p1341_p0), [#allocation2], %s622_s6 }
  0x67   : > { %1011 = dma.done.wait (%p1342_p5), %s234_s8, 256  }
  0x68   : > { %1013 = vsyncadd (%p1342_p5), %s234_s8, 4294967040  ;;  %p1343_p10 = scmp.eq.s32.totalorder %s1095_s22, 0 }
  0x6a   : > { %1015 = dma.done.wait (%p1343_p10), [#allocation6], 4096   ;;  %p1344_p1 = pmov %p1343_p10 }
  0x6b   : > { %v273_v0 = vld [vmem:[#allocation5] sm:$0xff]  ;;  %v274_v1 = vld [vmem:[#allocation5 + $0x8] sm:$0xff]  ;;  %v275_v2 = vld [vmem:[#allocation5 + $0x10] sm:$0xff]  ;;  %s627_s10 = sshll.u32 %s1095_s22, 4  ;;  %s270_s28 = scalar_lea.vmem [#allocation8], %s1247_s14 }
  0x6c   : > { %1017 = vsyncadd (%p1344_p1), [#allocation6], 4294963200  ;;  %v737_v3 = vpack.c.bf16 %v274_v1, %v273_v0  ;;  %v276_v4 = vld [vmem:[#allocation5 + $0x18] sm:$0xff]  ;;  %v277_v6 = vld [vmem:[#allocation5 + $0x20] sm:$0xff]  ;;  %s528_s12 = sshll.u32 %s270_s28, 4  ;;  %s1282_s11 = scalar_lea.hbm %s1330_s5, %s627_s10  ;;  %s1284_s12 = int_to_ptr.vmem [resolvable:$true] %s528_s12 }
  0x6d   : > { %v741_v5 = vpack.c.bf16 %v276_v4, %v275_v2  ;;  %v278_v7 = vld [vmem:[#allocation5 + $0x28] sm:$0xff]  ;;  %v279_v9 = vld [vmem:[#allocation5 + $0x30] sm:$0xff]  ;;  %v280_v10 = vld [vmem:[#allocation5 + $0x38] sm:$0xff]  ;;  %s516_s17 = scalar_lea.sflag [#allocation4], %s1247_s14  ;;  %s966_s7 = scalar_lea.vmem %s1284_s12, 16 }
  0x6e   : > { %738 = vmatprep.subr.bf16.mxu0 %v737_v3  ;;  %v745_v8 = vpack.c.bf16 %v278_v7, %v277_v6  ;;  %v1262_v11 = vld [vmem:[%s1251_s9] sm:$0xff]  ;;  %v374_v13 = vld [vmem:[#allocation7 + $0x8] sm:$0xff]  ;;  %v376_v16 = vld [vmem:[#allocation7 + $0x18] sm:$0xff]  ;;  %v749_v20 = vpack.c.bf16 %v280_v10, %v279_v9  ;;  %p967_p2 = scmp.ne.s32.totalorder %s1284_s12, %s966_s7  ;;  %s1043_s22 = smov [#allocation8]  }
  0x6f   : > { %740 = vmatpush3.bf16.msra.mxu0 %v737_v3  ;;  %699 = vmatprep.mubr.f32.mxu0 %v1262_v11  ;;  %v373_v12 = vld [vmem:[#allocation7] sm:$0xff]  ;;  %v375_v14 = vld [vmem:[#allocation7 + $0x10] sm:$0xff]  ;;  %v378_v19 = vld [vmem:[#allocation7 + $0x28] sm:$0xff]  ;;  %s970_s6 = sshll.u32 %s1043_s22, 4  ;;  %s971_s6 = int_to_ptr.vmem [resolvable:$false] %s970_s6 }
  0x70   : > { %742 = vmatprep.subr.bf16.mxu0 %v741_v5  ;;  %v769_v15 = vpack.c.bf16 %v374_v13, %v373_v12  ;;  %v773_v17 = vpack.c.bf16 %v376_v16, %v375_v14  ;;  %v377_v18 = vld [vmem:[#allocation7 + $0x20] sm:$0xff]  ;;  %v282_v22 = vld [vmem:[#allocation5 + $0x48] sm:$0xff]  ;;  %v379_v24 = vld [vmem:[#allocation7 + $0x30] sm:$0xff]  ;;  %p968_p4 = pnand %p967_p2, %p1192_p6  ;;  %s972_s8 = scalar_lea.vmem %s971_s6, 32 }
  0x71   : > { %v281_v21 = vld [vmem:[#allocation5 + $0x40] sm:$0xff]  ;;  %v777_v23 = vpack.c.bf16 %v378_v19, %v377_v18  ;;  %v380_v25 = vld [vmem:[#allocation7 + $0x38] sm:$0xff]  ;;  %v283_v27 = vld [vmem:[#allocation5 + $0x50] sm:$0xff]  ;;  %v494_v19 = vlaneseq  ;;  %p973_p11 = scmp.lt.s32.totalorder %s1284_s12, %s971_s6  ;;  %p974_p13 = scmp.lt.s32.totalorder %s972_s8, %s966_s7 }
  0x72   : > { %770 = vmatprep.subr.bf16.mxu1 %v769_v15  ;;  %v753_v26 = vpack.c.bf16 %v282_v22, %v281_v21  ;;  %v284_v28 = vld [vmem:[#allocation5 + $0x58] sm:$0xff]  ;;  %v781_v29 = vpack.c.bf16 %v380_v25, %v379_v24  ;;  %v285_v31 = vld [vmem:[#allocation5 + $0x60] sm:$0xff]  ;;  %v286_v32 = vld [vmem:[#allocation5 + $0x68] sm:$0xff]  ;;  %p969_p8 = pneg %p968_p4 }
  0x73   : > { %744 = vmatpush3.bf16.msra.mxu0 %v741_v5  ;;  %772 = vmatpush3.bf16.msra.mxu1 %v769_v15  ;;  %v757_v30 = vpack.c.bf16 %v284_v28, %v283_v27  ;;  %v761_v33 = vpack.c.bf16 %v286_v32, %v285_v31  ;;  %v287_v34 = vld [vmem:[#allocation5 + $0x70] sm:$0xff]  ;;  %v288_v35 = vld [vmem:[#allocation5 + $0x78] sm:$0xff]  ;;  %v381_v38 = vld [vmem:[#allocation7 + $0x40] sm:$0xff]  ;;  %p975_p3 = por %p974_p13, %p973_p11 }
  0x74   : > { %746 = vmatprep.subr.bf16.mxu0 %v745_v8  ;;  %774 = vmatprep.subr.bf16.mxu1 %v773_v17  ;;  %v765_v36 = vpack.c.bf16 %v288_v35, %v287_v34  ;;  %v1266_v37 = vld [vmem:[%s1251_s9 + $0x8] sm:$0xff]  ;;  %v383_v41 = vld [vmem:[#allocation7 + $0x50] sm:$0xff]  ;;  %v385_v44 = vld [vmem:[#allocation7 + $0x60] sm:$0xff] }
  0x75   : > { %v382_v39 = vld [vmem:[#allocation7 + $0x48] sm:$0xff]  ;;  %v384_v42 = vld [vmem:[#allocation7 + $0x58] sm:$0xff]  ;;  %v387_v46 = vld [vmem:[#allocation7 + $0x70] sm:$0xff]  ;;  %p976_p7 = pnand %p975_p3, %p969_p8 }
  0x76   : > { %v785_v40 = vpack.c.bf16 %v382_v39, %v381_v38  ;;  %v789_v43 = vpack.c.bf16 %v384_v42, %v383_v41  ;;  %v386_v45 = vld [vmem:[#allocation7 + $0x68] sm:$0xff]  ;;  %v388_v48 = vld [vmem:[#allocation7 + $0x78] sm:$0xff]  ;;  %v625_v50 = vld [vmem:[%s1327_s2] ss:$0 sm:$0xff] }
  0x77   : > { %748 = vmatpush3.bf16.msra.mxu0 %v745_v8  ;;  %776 = vmatpush3.bf16.msra.mxu1 %v773_v17  ;;  %v793_v47 = vpack.c.bf16 %v386_v45, %v385_v44  ;;  %v797_v49 = vpack.c.bf16 %v388_v48, %v387_v46  ;;  %v626_v57 = vld [vmem:[%s1329_s4] ss:$0 sm:$0xff] }
  0x78   : > { %750 = vmatprep.subr.bf16.mxu0 %v749_v20  ;;  %778 = vmatprep.subr.bf16.mxu1 %v777_v23 }
  0x7b   : > { %752 = vmatpush3.bf16.msra.mxu0 %v749_v20  ;;  %780 = vmatpush3.bf16.msra.mxu1 %v777_v23  ;;  %v495_v20 = vand.u32 127, %v494_v19 }
  0x7c   : > { %754 = vmatprep.subr.bf16.mxu0 %v753_v26  ;;  %782 = vmatprep.subr.bf16.mxu1 %v781_v29 }
  0x7d   : > { %vm496_vm0 = vcmp.lt.s32.totalorder %v495_v20, 4 }
  0x7f   : > { %756 = vmatpush3.bf16.msra.mxu0 %v753_v26  ;;  %784 = vmatpush3.bf16.msra.mxu1 %v781_v29 }
  0x80   : > { %758 = vmatprep.subr.bf16.mxu0 %v757_v30  ;;  %786 = vmatprep.subr.bf16.mxu1 %v785_v40 }
  0x83   : > { %760 = vmatpush3.bf16.msra.mxu0 %v757_v30  ;;  %788 = vmatpush3.bf16.msra.mxu1 %v785_v40 }
  0x84   : > { %762 = vmatprep.subr.bf16.mxu0 %v761_v33  ;;  %790 = vmatprep.subr.bf16.mxu1 %v789_v43 }
  0x87   : > { %764 = vmatpush3.bf16.msra.mxu0 %v761_v33  ;;  %792 = vmatpush3.bf16.msra.mxu1 %v789_v43 }
  0x88   : > { %766 = vmatprep.subr.bf16.mxu0 %v765_v36  ;;  %794 = vmatprep.subr.bf16.mxu1 %v793_v47 }
  0x8b   : > { %768 = vmatpush3.bf16.msra.mxu0 %v765_v36  ;;  %796 = vmatpush3.bf16.msra.mxu1 %v793_v47 }
  0x8c   : > { %798 = vmatprep.subr.bf16.mxu1 %v797_v49 }
  0x8e   : > { %700 = vmatmul.mubr.f32.vlgmr.msra.gmra.mrb[0].mxu0 %v1266_v37 }
  0x8f   : > { %800 = vmatpush3.bf16.msra.mxu1 %v797_v49 }
 0x161   : > { %v701_v51 = vpop.f32.mrb[0].mxu0 }
 0x162   : > { %v368_v52 = vadd.f32 %v701_v51, %v625_v50  ;;  %v362_v53 = vpop.f32.mrb[1].mxu0 }
 0x163   : > { %v363_v54 = vadd.f32 %v625_v50, %v362_v53 }
 0x165   : > { %870 = vtanh.f32 %v363_v54 }
 0x166   : > { %872 = vtanh.f32 %v368_v52 }
 0x16f   : > { %v871_v55 = vpop.eup %870 }
 0x170   : > { %v873_v56 = vpop.eup %872  ;;  %734 = vmatprep.mubr.f32.mxu1 %v871_v55 }
 0x171   : > { %735 = vmatmul.mubr.f32.vlgmr.msra.gmra.mrb[0].mxu1 %v873_v56 }
 0x244   : > { %v736_v58 = vpop.f32.mrb[0].mxu1 }
 0x245   : > { %v468_v59 = vadd.f32 %v736_v58, %v626_v57  ;;  %v462_v60 = vpop.f32.mrb[1].mxu1 }
 0x246   : > { %v463_v61 = vadd.f32 %v626_v57, %v462_v60 }
 0x248   : > { %v471_v62 = vmax.f32 %v463_v61, %v468_v59 }
 0x24a   : > { %v472_v63 = vrot.slane %v471_v62, 4 }
 0x24c   : > { %v473_v0 = vmax.f32 %v471_v62, %v472_v63 }
 0x24e   : > { %v474_v1 = vrot.slane %v473_v0, 2 }
 0x250   : > { %v475_v2 = vmax.f32 %v473_v0, %v474_v1 }
 0x252   : > { %v476_v3 = vrot.slane %v475_v2, 1 }
 0x254   : > { %v477_v4 = vmax.f32 %v475_v2, %v476_v3 }
 0x256   : > { %v478_v5 = vsub.f32 %v463_v61, %v477_v4  ;;  %v479_v6 = vsub.f32 %v468_v59, %v477_v4 }
 0x258   : > { %v480_v7 = vmul.f32 1.442695, %v478_v5  ;;  %v482_v8 = vmul.f32 1.442695, %v479_v6 }
 0x25a   : > { %874 = vpow2.f32 %v480_v7 }
 0x25b   : > { %876 = vpow2.f32 %v482_v8 }
 0x264   : > { %v875_v9 = vpop.eup %874 }
 0x265   : > { %v877_v10 = vpop.eup %876 }
 0x266   : > { %v484_v12 = vadd.f32 %v877_v10, %v875_v9 }
 0x268   : > { %v485_v13 = vrot.slane %v484_v12, 4 }
 0x26a   : > { %v486_v14 = vadd.f32 %v485_v13, %v484_v12 }
 0x26c   : > { %v487_v15 = vrot.slane %v486_v14, 2 }
 0x26e   : > { %v488_v16 = vadd.f32 %v487_v15, %v486_v14 }
 0x270   : > { %v489_v17 = vrot.slane %v488_v16, 1 }
 0x272   : > { %v490_v18 = vadd.f32 %v489_v17, %v488_v16 }
 0x274   : > { %878 = vrcp.f32 %v490_v18 }
 0x27e   : > { %v879_v21 = vpop.eup %878 }
 0x27f   : > { %v492_v22 = vmul.f32 %v879_v21, %v875_v9  ;;  %v493_v23 = vmul.f32 %v879_v21, %v877_v10 }
 0x281   : > { %v497_v24 = vsel %vm496_vm0, %v492_v22, 0.0  ;;  %v498_v25 = vsel %vm496_vm0, %v493_v23, 0.0 }
 0x282   : > { %499 = vadd.xlane.f32.xlu0 %v497_v24 }
 0x286   : > { %501 = vadd.xlane.f32.xlu0 %v498_v25 }
 0x30f   : > { %v500_v26 = vpop.xlane.xlu0 %499 }
 0x310   : > { %v503_v27 = vmul.f32 0.25, %v500_v26 }
 0x312   : > { %v505_v30 = vmul.f32 %v503_v27, %v1262_v11 }
 0x313   : > { %v502_v28 = vpop.xlane.xlu0 %501 }
 0x314   : > { %v504_v29 = vmul.f32 0.25, %v502_v28 }
 0x316   : > { %v506_v31 = vmul.f32 %v504_v29, %v1266_v37 }
 0x318   : > { %v507_v32 = vadd.f32 %v506_v31, %v505_v30 }
 0x31a   : > { %v508_v33 = vrot.slane %v507_v32, 4 }
 0x31c   : > { %v509_v34 = vadd.f32 %v508_v33, %v507_v32 }
 0x31e   : > { %v510_v35 = vrot.slane %v509_v34, 2 }
 0x320   : > { %v511_v36 = vadd.f32 %v510_v35, %v509_v34 }
 0x322   : > { %v512_v38 = vrot.slane %v511_v36, 1 }
 0x324   : > { %v513_v39 = vadd.f32 %v512_v38, %v511_v36 }
 0x326   : > { %514 = vst [vmem:[%s270_s28] sm:$0x1] %v513_v39 }
 0x327   : > { %979 = shalt.err (!%p976_p7)
}
 0x328   : > { %s980_s14 = scalar_lea.hbm %s1282_s11, 16  ;;  %s984_s26 = scalar_lea.hbm %s1330_s5, 64 }
 0x329   : > { %p981_p9 = scmp.ne.s32.totalorder %s1282_s11, %s980_s14  ;;  %p985_p5 = scmp.lt.u32.totalorder %s1282_s11, %s1330_s5 }
 0x32a   : > { %p986_p10 = scmp.lt.u32.totalorder %s984_s26, %s980_s14  ;;  %p988_p2 = scmp.lt.u32.totalorder %s980_s14, %s1282_s11 }
 0x32b   : > { %p982_p12 = pnand %p981_p9, %p1192_p6 }
 0x32c   : > { %p987_p1 = por %p986_p10, %p985_p5 }
 0x32d   : > { %p983_p0 = pneg %p982_p12 }
 0x32e   : > { %p989_p4 = por %p988_p2, %p987_p1 }
 0x330   : > { %p990_p8 = pnand %p989_p4, %p983_p0 }
 0x332   : > { %993 = shalt.err (!%p990_p8)
}
 0x333   : > { %811 = dma.vmem_to_hbm [thread:$0]  (%p1192_p6), %s1284_s12, 16, %s1282_s11, %s516_s17  }
 0x334 PF: > { %p833_p11 = scmp.ge.s32.totalorder %s1036_s21, 2  ;;  %s540_s10 = sand.u32 1, %s1024_s18  }
 0x335   : > { %p1345_p13 = scmp.ne.s32.totalorder %s1335_s25, 0  ;;  %s541_s28 = scalar_lea.sflag [#allocation4], %s540_s10 }
 0x337   : > { %p825_p3 = pnand %p833_p11, %p1345_p13 }
 0x339   : > { %1019 = dma.done.wait (!%p825_p3), %s541_s28, 16  }
 0x33a   : > { %1021 = vsyncadd (!%p825_p3), %s541_s28, 4294967280  ;;  %p19_p7 = scmp.ge.s32.totalorder %s1182_s29, 6   ;;  %s1346_s18 = smov %s1028_s19 }
 0x33b   : > { %s1347_s19 = smov %s1032_s20  ;;  %s1348_s20 = smov %s1198_s27 }
 0x33c   : > { %s1349_s21 = smov %s1182_s29  ;;  %21 = sbr.rel (!%p19_p7) target bundleno = 6 (0x6), region = 93 }
 0x343   :  { %545 = vsyncpa [#allocation3], 1 }
 0x344   :  { %547 = vsyncpa [#allocation3 + $0x1], 1 }
 0x345   :  { %548 = vsyncpa [#allocation6], 1 }
 0x346   :  { %549 = vsyncpa [#allocation4], 1 }
 0x347   :  { %551 = vsyncpa [#allocation4 + $0x1], 1 }

</bundles_post_ra>
